<compile_context>
chip_gen: v7x
topology: tpu7x:2x2x1
jax: 0.10.0
libtpu: 0.0.40
codegen_flags: <defaults>
</compile_context>

<pallas_src>
import jax
import jax.numpy as jnp
from jax.experimental import pallas as pl
from jax.experimental.pallas import tpu as pltpu

MIN_NORM = 1e-15                    # geoopt norm / denominator clamp
ATANH_CLAMP = 1.0 - 1e-7            # geoopt artanh argument clamp
MAX_ARTANH = 8.317766166719343      # artanh(1 - 1e-7); artanh(tanh(t)) == min(t, this)


# --------------------------- in-kernel helpers ---------------------------

def _artanh_kernel(x):
    """artanh with geoopt's clamp; EUP approx reciprocal instead of divide."""
    x = jnp.clip(x, -ATANH_CLAMP, ATANH_CLAMP)
    return 0.5 * jnp.log((1.0 + x) * pl.reciprocal(1.0 - x, approx=True))


def _hyperbolic_transform(x2d, proj_t, mob_t, *, need_z=True):
    """expmap0(x @ proj.T) followed by mobius_matvec(mobius, .), curvature -1.

    x2d: (N, D) float32, proj_t: (D, R), mob_t: (R, R)  (pre-transposed weights
    so the MXU sees the natural layout, no in-kernel transposes).

    Returns (z, u) where z: (N, R) transformed points (or None if not needed)
    and u: (N, 1) with  ||z|| == tanh(u)  (u = ||Mx y|| / ||y|| * artanh(||y||)).
    """
    p = jnp.dot(x2d, proj_t, preferred_element_type=jnp.float32)          # (N, R)
    p_sq = jnp.sum(p * p, axis=-1, keepdims=True)
    p_norm = jnp.sqrt(p_sq)
    inv_p_norm = jax.lax.rsqrt(jnp.maximum(p_sq, MIN_NORM * MIN_NORM))
    tanh_p = jnp.tanh(p_norm)
    y = (tanh_p * inv_p_norm) * p                                         # expmap0

    my = jnp.dot(y, mob_t, preferred_element_type=jnp.float32)            # (N, R)
    my_sq = jnp.sum(my * my, axis=-1, keepdims=True)
    my_norm = jnp.sqrt(my_sq)
    inv_my_norm = jax.lax.rsqrt(jnp.maximum(my_sq, MIN_NORM * MIN_NORM))

    # ||y|| == tanh(||p||)  =>  artanh(||y||) == min(||p||, artanh(1 - 1e-7)).
    inv_y_norm = pl.reciprocal(jnp.maximum(tanh_p, MIN_NORM), approx=True)
    u = my_norm * inv_y_norm * jnp.minimum(p_norm, MAX_ARTANH)            # (N, 1)

    z = None
    if need_z:
        z = (jnp.tanh(u) * inv_my_norm) * my                              # (N, R)
    return z, u


# ------------------------------- kernel ---------------------------------

def joint_probe_kernel(x_ref, dproj_ref, dmob_ref, hproj_ref, hmob_ref,
                       dist_ref, depth_ref):
    bb, s, d = x_ref.shape
    x2d = x_ref[...].reshape(bb * s, d)          # fold batch into sublanes

    # ---------------- distance probe: pairwise hyperbolic distances ----------
    z, _ = _hyperbolic_transform(x2d, dproj_ref[...], dmob_ref[...])
    r = z.shape[-1]
    z3 = z.reshape(bb, s, r)                                              # (bb, s, r)

    # dist(z_i, z_j) = 2 * artanh(||mobius_add(-z_i, z_j)||), closed form from
    # the Gram matrix:
    #   A = 1 - 2<z_i,z_j> + ||z_j||^2 ,  B = 1 - ||z_i||^2
    #   ||num||^2 = A^2 ||z_i||^2 - 2 A B <z_i,z_j> + B^2 ||z_j||^2
    #   den       = 1 - 2<z_i,z_j> + ||z_i||^2 ||z_j||^2
    gram = jnp.einsum("bik,bjk->bij", z3, z3,
                      preferred_element_type=jnp.float32)                 # (bb, s, s)
    sq = jnp.sum(z3 * z3, axis=-1)                                        # (bb, s)
    ni2 = sq[:, :, None]
    nj2 = sq[:, None, :]
    a = 1.0 - 2.0 * gram + nj2
    b = 1.0 - ni2
    num_sq = a * a * ni2 - 2.0 * a * b * gram + b * b * nj2
    den = 1.0 - 2.0 * gram + ni2 * nj2
    inv_den = pl.reciprocal(jnp.maximum(den, MIN_NORM), approx=True)
    madd_norm = jnp.sqrt(jnp.maximum(num_sq, 0.0)) * inv_den
    dist_ref[...] = 2.0 * _artanh_kernel(madd_norm)

    # ---------------- depth probe: distance from the origin -----------------
    # dist(0, z) = 2 * artanh(||z||) and ||z|| = tanh(u)  =>  2 * min(u, clamp)
    _, u = _hyperbolic_transform(x2d, hproj_ref[...], hmob_ref[...], need_z=False)
    depth_ref[...] = (2.0 * jnp.minimum(u, MAX_ARTANH)).reshape(bb, s, 1)


# ------------------------------- wrapper ---------------------------------

def _choose_block_b(batch, seq, dim, rank, vmem_budget_bytes=40 * 1024 * 1024):
    # f32 bytes resident per batch element in one grid step: x block and both
    # output blocks (double-buffered) plus ~8 live (seq, seq) temporaries in
    # the pairwise elementwise stage plus projected activations.
    per_b = 4 * (2 * seq * dim + 2 * seq * seq + 2 * seq
                 + 8 * seq * seq + 4 * seq * rank)
    bb = max(1, min(batch, vmem_budget_bytes // max(per_b, 1)))
    if batch >= 2:
        bb = min(bb, batch // 2)      # keep >= 2 grid steps (v7x has 2 TCs)
    bb = max(bb, 1)
    while batch % bb:
        bb -= 1
    return bb


def joint_hyperbolic_probe(embeddings, dist_proj, dist_mobius,
                           depth_proj, depth_mobius, *, block_b=None):
    """Pallas TPU implementation of JointHyperbolicProbe.forward(task='both').

    Returns (distances (B, S, S) float32, depths (B, S) float32)."""
    x = jnp.asarray(embeddings, jnp.float32)
    B, S, D = x.shape
    Rd = dist_proj.shape[0]
    Rh = depth_proj.shape[0]

    if block_b is None:
        block_b = _choose_block_b(B, S, D, max(Rd, Rh))
    assert B % block_b == 0, "block_b must divide the batch size"

    # Pre-transpose the weights in the wrapper so every in-kernel matmul is
    # x @ W with the natural layout (no per-step XLU transpose).
    dproj_t = jnp.asarray(dist_proj, jnp.float32).T      # (D, Rd)
    dmob_t = jnp.asarray(dist_mobius, jnp.float32).T     # (Rd, Rd)
    hproj_t = jnp.asarray(depth_proj, jnp.float32).T     # (D, Rh)
    hmob_t = jnp.asarray(depth_mobius, jnp.float32).T    # (Rh, Rh)

    est_bytes = (4 * block_b * (2 * S * D + 2 * S * S + 2 * S
                                + 8 * S * S + 4 * S * max(Rd, Rh))
                 + 8 * 4 * (D * Rd + Rd * Rd + D * Rh + Rh * Rh))
    vmem_limit = int(min(64 * 1024 * 1024,
                         max(32 * 1024 * 1024, est_bytes * 3 // 2)))

    distances, depths = pl.pallas_call(
        joint_probe_kernel,
        out_shape=(
            jax.ShapeDtypeStruct((B, S, S), jnp.float32),
            jax.ShapeDtypeStruct((B, S, 1), jnp.float32),
        ),
        grid=(B // block_b,),
        in_specs=[
            pl.BlockSpec((block_b, S, D), lambda b: (b, 0, 0)),
            pl.BlockSpec((D, Rd), lambda b: (0, 0)),
            pl.BlockSpec((Rd, Rd), lambda b: (0, 0)),
            pl.BlockSpec((D, Rh), lambda b: (0, 0)),
            pl.BlockSpec((Rh, Rh), lambda b: (0, 0)),
        ],
        out_specs=(
            pl.BlockSpec((block_b, S, S), lambda b: (b, 0, 0)),
            pl.BlockSpec((block_b, S, 1), lambda b: (b, 0, 0)),
        ),
        compiler_params=pltpu.CompilerParams(
            dimension_semantics=("parallel",),
            vmem_limit_bytes=vmem_limit),
    )(x, dproj_t, dmob_t, hproj_t, hmob_t)

    return distances, depths[..., 0]


# ---------------- pure-JAX reference (verification only) ----------------

def _ref_artanh(x):
    x = jnp.clip(x, -ATANH_CLAMP, ATANH_CLAMP)
    return 0.5 * jnp.log((1.0 + x) / (1.0 - x))


def _ref_transform(x, proj, mob):
    p = x @ proj.T
    pn = jnp.maximum(jnp.sqrt(jnp.sum(p * p, -1, keepdims=True)), MIN_NORM)
    y = jnp.tanh(pn) * p / pn
    yn = jnp.maximum(jnp.sqrt(jnp.sum(y * y, -1, keepdims=True)), MIN_NORM)
    my = y @ mob.T
    myn = jnp.maximum(jnp.sqrt(jnp.sum(my * my, -1, keepdims=True)), MIN_NORM)
    return jnp.tanh(myn / yn * _ref_artanh(yn)) * my / myn


def _ref_dist(a, b):
    ab = jnp.sum((-a) * b, -1, keepdims=True)
    na2 = jnp.sum(a * a, -1, keepdims=True)
    nb2 = jnp.sum(b * b, -1, keepdims=True)
    num = (1 + 2 * ab + nb2) * (-a) + (1 - na2) * b
    den = jnp.maximum(1 + 2 * ab + na2 * nb2, MIN_NORM)
    madd = num / den
    return 2.0 * _ref_artanh(jnp.sqrt(jnp.sum(madd * madd, -1)))


def _ref_forward(x, dist_proj, dist_mob, depth_proj, depth_mob):
    zd = _ref_transform(x, dist_proj, dist_mob)                  # (B, S, R)
    distances = _ref_dist(zd[:, :, None, :], zd[:, None, :, :])  # (B, S, S)
    zh = _ref_transform(x, depth_proj, depth_mob)                # (B, S, R)
    depths = _ref_dist(jnp.zeros_like(zh), zh)                   # (B, S)
    return distances, depths


if __name__ == "__main__":
    B, S, D = 2, 8, 32
    probe_rank = 16

    key = jax.random.PRNGKey(0)
    k_x, k1, k2, k3, k4 = jax.random.split(key, 5)

    def _init(k, shape):  # nn.init.uniform_(-0.05, 0.05)
        return jax.random.uniform(k, shape, minval=-0.05, maxval=0.05,
                                  dtype=jnp.float32)

    x = jax.random.normal(k_x, (B, S, D), dtype=jnp.float32)
    dist_proj = _init(k1, (probe_rank, D))
    dist_mob = _init(k2, (probe_rank, probe_rank))
    depth_proj = _init(k3, (probe_rank, D))
    depth_mob = _init(k4, (probe_rank, probe_rank))

    distances, depths = jax.block_until_ready(
        joint_hyperbolic_probe(x, dist_proj, dist_mob, depth_proj, depth_mob))

    dist_ref, depth_ref = _ref_forward(x, dist_proj, dist_mob,
                                       depth_proj, depth_mob)

    assert distances.shape == (B, S, S) and depths.shape == (B, S)
    assert bool(jnp.all(jnp.isfinite(distances)))
    assert bool(jnp.all(jnp.isfinite(depths)))
    assert jnp.allclose(distances, dist_ref, atol=2e-3, rtol=2e-2)
    assert jnp.allclose(depths, depth_ref, atol=2e-3, rtol=2e-2)
    # distance matrix must be symmetric
    assert jnp.allclose(distances, jnp.swapaxes(distances, 1, 2), atol=1e-3)

    print("KERNEL_OK")
</pallas_src>

<mosaic_0001>
module attributes {stable_mosaic.version = 11 : i64} {
  func.func @joint_probe_kernel(%arg0: i32, %arg1: memref<1x8x32xf32, #tpu.memory_space<vmem>>, %arg2: memref<32x16xf32, #tpu.memory_space<vmem>>, %arg3: memref<16x16xf32, #tpu.memory_space<vmem>>, %arg4: memref<32x16xf32, #tpu.memory_space<vmem>>, %arg5: memref<16x16xf32, #tpu.memory_space<vmem>>, %arg6: memref<1x8x8xf32, #tpu.memory_space<vmem>>, %arg7: memref<1x8x1xf32, #tpu.memory_space<vmem>>) attributes {dimension_semantics = [#tpu.dimension_semantics<parallel>], iteration_bounds = array<i64: 2>, scalar_prefetch = 0 : i64, scratch_operands = 0 : i64, tpu.core_type = #tpu.core_type<tc>, window_params = [{transform_indices = @transform_0, window_bounds = array<i64: 1, 8, 32>}, {pipeline_mode = #tpu.pipeline_mode<synchronous>, transform_indices = @transform_1, window_bounds = array<i64: 32, 16>}, {pipeline_mode = #tpu.pipeline_mode<synchronous>, transform_indices = @transform_2, window_bounds = array<i64: 16, 16>}, {pipeline_mode = #tpu.pipeline_mode<synchronous>, transform_indices = @transform_3, window_bounds = array<i64: 32, 16>}, {pipeline_mode = #tpu.pipeline_mode<synchronous>, transform_indices = @transform_4, window_bounds = array<i64: 16, 16>}, {transform_indices = @transform_5, window_bounds = array<i64: 1, 8, 8>}, {transform_indices = @transform_6, window_bounds = array<i64: 1, 8, 1>}]} {
    %c0 = arith.constant 0 : index
    %c0_0 = arith.constant 0 : index
    %c0_1 = arith.constant 0 : index
    %0 = vector.load %arg1[%c0, %c0_0, %c0_1] : memref<1x8x32xf32, #tpu.memory_space<vmem>>, vector<1x8x32xf32>
    %1 = vector.shape_cast %0 : vector<1x8x32xf32> to vector<8x32xf32>
    %c0_2 = arith.constant 0 : index
    %c0_3 = arith.constant 0 : index
    %2 = vector.load %arg2[%c0_2, %c0_3] : memref<32x16xf32, #tpu.memory_space<vmem>>, vector<32x16xf32>
    %c0_4 = arith.constant 0 : index
    %c0_5 = arith.constant 0 : index
    %3 = vector.load %arg3[%c0_4, %c0_5] : memref<16x16xf32, #tpu.memory_space<vmem>>, vector<16x16xf32>
    %cst = arith.constant dense<0.000000e+00> : vector<8x16xf32>
    %4 = tpu.matmul %1, %2, %cst {dimension_numbers = #tpu.dot_dimension_numbers<[1], [0], [0], [1], [0, 0, 1, 1], [], []>} : vector<8x32xf32>, vector<32x16xf32>, vector<8x16xf32> -> vector<8x16xf32>
    %5 = arith.mulf %4, %4 : vector<8x16xf32>
    %cst_6 = arith.constant dense<0.000000e+00> : vector<8xf32>
    %6 = vector.multi_reduction <add>, %5, %cst_6 [1] : vector<8x16xf32> to vector<8xf32>
    %7 = vector.shape_cast %6 : vector<8xf32> to vector<8x1xf32>
    %8 = math.sqrt %7 : vector<8x1xf32>
    %cst_7 = arith.constant 1.000000e-30 : f32
    %9 = vector.broadcast %cst_7 : f32 to vector<8x1xf32>
    %10 = arith.maximumf %7, %9 : vector<8x1xf32>
    %11 = math.rsqrt %10 : vector<8x1xf32>
    %12 = math.tanh %8 : vector<8x1xf32>
    %13 = arith.mulf %12, %11 : vector<8x1xf32>
    %14 = vector.broadcast %13 : vector<8x1xf32> to vector<8x16xf32>
    %15 = arith.mulf %14, %4 : vector<8x16xf32>
    %cst_8 = arith.constant dense<0.000000e+00> : vector<8x16xf32>
    %16 = tpu.matmul %15, %3, %cst_8 {dimension_numbers = #tpu.dot_dimension_numbers<[1], [0], [0], [1], [0, 0, 1, 1], [], []>} : vector<8x16xf32>, vector<16x16xf32>, vector<8x16xf32> -> vector<8x16xf32>
    %17 = arith.mulf %16, %16 : vector<8x16xf32>
    %cst_9 = arith.constant dense<0.000000e+00> : vector<8xf32>
    %18 = vector.multi_reduction <add>, %17, %cst_9 [1] : vector<8x16xf32> to vector<8xf32>
    %19 = vector.shape_cast %18 : vector<8xf32> to vector<8x1xf32>
    %20 = math.sqrt %19 : vector<8x1xf32>
    %cst_10 = arith.constant 1.000000e-30 : f32
    %21 = vector.broadcast %cst_10 : f32 to vector<8x1xf32>
    %22 = arith.maximumf %19, %21 : vector<8x1xf32>
    %23 = math.rsqrt %22 : vector<8x1xf32>
    %cst_11 = arith.constant 1.000000e-15 : f32
    %24 = vector.broadcast %cst_11 : f32 to vector<8x1xf32>
    %25 = arith.maximumf %12, %24 : vector<8x1xf32>
    %26 = tpu.reciprocal %25 {approx = true} : vector<8x1xf32> -> vector<8x1xf32>
    %27 = arith.mulf %20, %26 : vector<8x1xf32>
    %cst_12 = arith.constant 8.31776618 : f32
    %28 = vector.broadcast %cst_12 : f32 to vector<8x1xf32>
    %29 = arith.minimumf %8, %28 : vector<8x1xf32>
    %30 = arith.mulf %27, %29 : vector<8x1xf32>
    %31 = math.tanh %30 : vector<8x1xf32>
    %32 = arith.mulf %31, %23 : vector<8x1xf32>
    %33 = vector.broadcast %32 : vector<8x1xf32> to vector<8x16xf32>
    %34 = arith.mulf %33, %16 : vector<8x16xf32>
    %35 = vector.shape_cast %34 : vector<8x16xf32> to vector<1x8x16xf32>
    "tpu.trace_start"() <{level = 10 : i32, message = "bik,bjk->bij"}> : () -> ()
    %cst_13 = arith.constant dense<0.000000e+00> : vector<1x8x8xf32>
    %36 = tpu.matmul %35, %35, %cst_13 {dimension_numbers = #tpu.dot_dimension_numbers<[2], [2], [1], [1], [0, 0, 0, 1, 1, 1], [0], [0]>} : vector<1x8x16xf32>, vector<1x8x16xf32>, vector<1x8x8xf32> -> vector<1x8x8xf32>
    "tpu.trace_stop"() : () -> ()
    %37 = arith.mulf %35, %35 : vector<1x8x16xf32>
    %cst_14 = arith.constant dense<0.000000e+00> : vector<1x8xf32>
    %38 = vector.multi_reduction <add>, %37, %cst_14 [2] : vector<1x8x16xf32> to vector<1x8xf32>
    %39 = vector.shape_cast %38 : vector<1x8xf32> to vector<1x8x1xf32>
    %40 = vector.shape_cast %38 : vector<1x8xf32> to vector<1x1x8xf32>
    %cst_15 = arith.constant 2.000000e+00 : f32
    %41 = vector.broadcast %cst_15 : f32 to vector<1x8x8xf32>
    %42 = arith.mulf %41, %36 : vector<1x8x8xf32>
    %cst_16 = arith.constant 1.000000e+00 : f32
    %43 = vector.broadcast %cst_16 : f32 to vector<1x8x8xf32>
    %44 = arith.subf %43, %42 : vector<1x8x8xf32>
    %45 = vector.broadcast %40 : vector<1x1x8xf32> to vector<1x8x8xf32>
    %46 = arith.addf %44, %45 : vector<1x8x8xf32>
    %cst_17 = arith.constant 1.000000e+00 : f32
    %47 = vector.broadcast %cst_17 : f32 to vector<1x8x1xf32>
    %48 = arith.subf %47, %39 : vector<1x8x1xf32>
    %49 = arith.mulf %46, %46 : vector<1x8x8xf32>
    %50 = vector.broadcast %39 : vector<1x8x1xf32> to vector<1x8x8xf32>
    %51 = arith.mulf %49, %50 : vector<1x8x8xf32>
    %cst_18 = arith.constant 2.000000e+00 : f32
    %52 = vector.broadcast %cst_18 : f32 to vector<1x8x8xf32>
    %53 = arith.mulf %52, %46 : vector<1x8x8xf32>
    %54 = vector.broadcast %48 : vector<1x8x1xf32> to vector<1x8x8xf32>
    %55 = arith.mulf %53, %54 : vector<1x8x8xf32>
    %56 = arith.mulf %55, %36 : vector<1x8x8xf32>
    %57 = arith.subf %51, %56 : vector<1x8x8xf32>
    %58 = arith.mulf %48, %48 : vector<1x8x1xf32>
    %59 = vector.broadcast %58 : vector<1x8x1xf32> to vector<1x8x8xf32>
    %60 = vector.broadcast %40 : vector<1x1x8xf32> to vector<1x8x8xf32>
    %61 = arith.mulf %59, %60 : vector<1x8x8xf32>
    %62 = arith.addf %57, %61 : vector<1x8x8xf32>
    %cst_19 = arith.constant 2.000000e+00 : f32
    %63 = vector.broadcast %cst_19 : f32 to vector<1x8x8xf32>
    %64 = arith.mulf %63, %36 : vector<1x8x8xf32>
    %cst_20 = arith.constant 1.000000e+00 : f32
    %65 = vector.broadcast %cst_20 : f32 to vector<1x8x8xf32>
    %66 = arith.subf %65, %64 : vector<1x8x8xf32>
    %67 = vector.broadcast %39 : vector<1x8x1xf32> to vector<1x8x8xf32>
    %68 = vector.broadcast %40 : vector<1x1x8xf32> to vector<1x8x8xf32>
    %69 = arith.mulf %67, %68 : vector<1x8x8xf32>
    %70 = arith.addf %66, %69 : vector<1x8x8xf32>
    %cst_21 = arith.constant 1.000000e-15 : f32
    %71 = vector.broadcast %cst_21 : f32 to vector<1x8x8xf32>
    %72 = arith.maximumf %70, %71 : vector<1x8x8xf32>
    %73 = tpu.reciprocal %72 {approx = true} : vector<1x8x8xf32> -> vector<1x8x8xf32>
    %cst_22 = arith.constant 0.000000e+00 : f32
    %74 = vector.broadcast %cst_22 : f32 to vector<1x8x8xf32>
    %75 = arith.maximumf %62, %74 : vector<1x8x8xf32>
    %76 = math.sqrt %75 : vector<1x8x8xf32>
    %77 = arith.mulf %76, %73 : vector<1x8x8xf32>
    %cst_23 = arith.constant -0.99999988 : f32
    %cst_24 = arith.constant 0.99999988 : f32
    %78 = vector.broadcast %cst_23 : f32 to vector<1x8x8xf32>
    %79 = arith.maximumf %78, %77 : vector<1x8x8xf32>
    %80 = vector.broadcast %cst_24 : f32 to vector<1x8x8xf32>
    %81 = arith.minimumf %80, %79 : vector<1x8x8xf32>
    %cst_25 = arith.constant 1.000000e+00 : f32
    %82 = vector.broadcast %cst_25 : f32 to vector<1x8x8xf32>
    %83 = arith.addf %82, %81 : vector<1x8x8xf32>
    %cst_26 = arith.constant 1.000000e+00 : f32
    %84 = vector.broadcast %cst_26 : f32 to vector<1x8x8xf32>
    %85 = arith.subf %84, %81 : vector<1x8x8xf32>
    %86 = tpu.reciprocal %85 {approx = true} : vector<1x8x8xf32> -> vector<1x8x8xf32>
    %87 = arith.mulf %83, %86 : vector<1x8x8xf32>
    %88 = math.log %87 : vector<1x8x8xf32>
    %cst_27 = arith.constant 5.000000e-01 : f32
    %89 = vector.broadcast %cst_27 : f32 to vector<1x8x8xf32>
    %90 = arith.mulf %89, %88 : vector<1x8x8xf32>
    %cst_28 = arith.constant 2.000000e+00 : f32
    %91 = vector.broadcast %cst_28 : f32 to vector<1x8x8xf32>
    %92 = arith.mulf %91, %90 : vector<1x8x8xf32>
    %c0_29 = arith.constant 0 : index
    %c0_30 = arith.constant 0 : index
    %c0_31 = arith.constant 0 : index
    %93 = vector.load %arg6[%c0_29, %c0_30, %c0_31] : memref<1x8x8xf32, #tpu.memory_space<vmem>>, vector<1x8x8xf32>
    tpu.vector_store %arg6[%c0_29, %c0_30, %c0_31], %92 {strides = array<i32>} : memref<1x8x8xf32, #tpu.memory_space<vmem>>, vector<1x8x8xf32>,
    %c0_32 = arith.constant 0 : index
    %c0_33 = arith.constant 0 : index
    %94 = vector.load %arg4[%c0_32, %c0_33] : memref<32x16xf32, #tpu.memory_space<vmem>>, vector<32x16xf32>
    %c0_34 = arith.constant 0 : index
    %c0_35 = arith.constant 0 : index
    %95 = vector.load %arg5[%c0_34, %c0_35] : memref<16x16xf32, #tpu.memory_space<vmem>>, vector<16x16xf32>
    %cst_36 = arith.constant dense<0.000000e+00> : vector<8x16xf32>
    %96 = tpu.matmul %1, %94, %cst_36 {dimension_numbers = #tpu.dot_dimension_numbers<[1], [0], [0], [1], [0, 0, 1, 1], [], []>} : vector<8x32xf32>, vector<32x16xf32>, vector<8x16xf32> -> vector<8x16xf32>
    %97 = arith.mulf %96, %96 : vector<8x16xf32>
    %cst_37 = arith.constant dense<0.000000e+00> : vector<8xf32>
    %98 = vector.multi_reduction <add>, %97, %cst_37 [1] : vector<8x16xf32> to vector<8xf32>
    %99 = vector.shape_cast %98 : vector<8xf32> to vector<8x1xf32>
    %100 = math.sqrt %99 : vector<8x1xf32>
    %cst_38 = arith.constant 1.000000e-30 : f32
    %101 = vector.broadcast %cst_38 : f32 to vector<8x1xf32>
    %102 = arith.maximumf %99, %101 : vector<8x1xf32>
    %103 = math.rsqrt %102 : vector<8x1xf32>
    %104 = math.tanh %100 : vector<8x1xf32>
    %105 = arith.mulf %104, %103 : vector<8x1xf32>
    %106 = vector.broadcast %105 : vector<8x1xf32> to vector<8x16xf32>
    %107 = arith.mulf %106, %96 : vector<8x16xf32>
    %cst_39 = arith.constant dense<0.000000e+00> : vector<8x16xf32>
    %108 = tpu.matmul %107, %95, %cst_39 {dimension_numbers = #tpu.dot_dimension_numbers<[1], [0], [0], [1], [0, 0, 1, 1], [], []>} : vector<8x16xf32>, vector<16x16xf32>, vector<8x16xf32> -> vector<8x16xf32>
    %109 = arith.mulf %108, %108 : vector<8x16xf32>
    %cst_40 = arith.constant dense<0.000000e+00> : vector<8xf32>
    %110 = vector.multi_reduction <add>, %109, %cst_40 [1] : vector<8x16xf32> to vector<8xf32>
    %111 = vector.shape_cast %110 : vector<8xf32> to vector<8x1xf32>
    %112 = math.sqrt %111 : vector<8x1xf32>
    %cst_41 = arith.constant 1.000000e-15 : f32
    %113 = vector.broadcast %cst_41 : f32 to vector<8x1xf32>
    %114 = arith.maximumf %104, %113 : vector<8x1xf32>
    %115 = tpu.reciprocal %114 {approx = true} : vector<8x1xf32> -> vector<8x1xf32>
    %116 = arith.mulf %112, %115 : vector<8x1xf32>
    %cst_42 = arith.constant 8.31776618 : f32
    %117 = vector.broadcast %cst_42 : f32 to vector<8x1xf32>
    %118 = arith.minimumf %100, %117 : vector<8x1xf32>
    %119 = arith.mulf %116, %118 : vector<8x1xf32>
    %cst_43 = arith.constant 8.31776618 : f32
    %120 = vector.broadcast %cst_43 : f32 to vector<8x1xf32>
    %121 = arith.minimumf %119, %120 : vector<8x1xf32>
    %cst_44 = arith.constant 2.000000e+00 : f32
    %122 = vector.broadcast %cst_44 : f32 to vector<8x1xf32>
    %123 = arith.mulf %122, %121 : vector<8x1xf32>
    %124 = vector.shape_cast %123 : vector<8x1xf32> to vector<1x8x1xf32>
    %c0_45 = arith.constant 0 : index
    %c0_46 = arith.constant 0 : index
    %c0_47 = arith.constant 0 : index
    %125 = vector.load %arg7[%c0_45, %c0_46, %c0_47] : memref<1x8x1xf32, #tpu.memory_space<vmem>>, vector<1x8x1xf32>
    tpu.vector_store %arg7[%c0_45, %c0_46, %c0_47], %124 {strides = array<i32>} : memref<1x8x1xf32, #tpu.memory_space<vmem>>, vector<1x8x1xf32>,
    return
  }
  func.func @transform_0(%arg0: i32) -> (i32, i32, i32) {
    %c0_i32 = arith.constant 0 : i32
    %c0_i32_0 = arith.constant 0 : i32
    %c0_i32_1 = arith.constant 0 : i32
    return %arg0, %c0_i32, %c0_i32_0 : i32, i32, i32
  }
  func.func @transform_1(%arg0: i32) -> (i32, i32) {
    %c0_i32 = arith.constant 0 : i32
    %c0_i32_0 = arith.constant 0 : i32
    %c0_i32_1 = arith.constant 0 : i32
    return %c0_i32, %c0_i32_0 : i32, i32
  }
  func.func @transform_2(%arg0: i32) -> (i32, i32) {
    %c0_i32 = arith.constant 0 : i32
    %c0_i32_0 = arith.constant 0 : i32
    %c0_i32_1 = arith.constant 0 : i32
    return %c0_i32, %c0_i32_0 : i32, i32
  }
  func.func @transform_3(%arg0: i32) -> (i32, i32) {
    %c0_i32 = arith.constant 0 : i32
    %c0_i32_0 = arith.constant 0 : i32
    %c0_i32_1 = arith.constant 0 : i32
    return %c0_i32, %c0_i32_0 : i32, i32
  }
  func.func @transform_4(%arg0: i32) -> (i32, i32) {
    %c0_i32 = arith.constant 0 : i32
    %c0_i32_0 = arith.constant 0 : i32
    %c0_i32_1 = arith.constant 0 : i32
    return %c0_i32, %c0_i32_0 : i32, i32
  }
  func.func @transform_5(%arg0: i32) -> (i32, i32, i32) {
    %c0_i32 = arith.constant 0 : i32
    %c0_i32_0 = arith.constant 0 : i32
    %c0_i32_1 = arith.constant 0 : i32
    return %arg0, %c0_i32, %c0_i32_0 : i32, i32, i32
  }
  func.func @transform_6(%arg0: i32) -> (i32, i32, i32) {
    %c0_i32 = arith.constant 0 : i32
    %c0_i32_0 = arith.constant 0 : i32
    %c0_i32_1 = arith.constant 0 : i32
    return %arg0, %c0_i32, %c0_i32_0 : i32, i32, i32
  }
}

</mosaic_0001>

<bundles_post_ra>
// kernel: tpu_custom_call.1
= control target key start
LH: loop header
LB: loop body
LE: loop exit
PB: predicated region body
PF: predicated region fallthrough
CT: control target
= control target key end

     0   :  { %12 = vsyncpa [#allocation3], 0  ;;  %s1331_s0 = inlined_call_operand.vmem [shape: f32[2,8,32], index: 0, kind: input, shape index: {}]   ;;  %s1332_s1 = inlined_call_operand.vmem [shape: f32[32,16], index: 1, kind: input, shape index: {}]   ;;  %s1333_s2 = inlined_call_operand.vmem [shape: f32[16,16], index: 2, kind: input, shape index: {}]   ;;  %s1334_s3 = inlined_call_operand.vmem [shape: f32[32,16], index: 3, kind: input, shape index: {}]   ;;  %s1335_s4 = inlined_call_operand.vmem [shape: f32[16,16], index: 4, kind: input, shape index: {}]   ;;  %s1336_s5 = inlined_call_operand.hbm [shape: f32[2,8,8], index: 5, kind: output, shape index: {0}]   ;;  %s1337_s6 = inlined_call_operand.vmem [shape: f32[2,8,1], index: 6, kind: output, shape index: {1}]  }
   0x1   :  { %14 = vsyncpa [#allocation3 + $0x1], 0  ;;  %s1146_s21 = smov 0   ;;  %s1148_s22 = smov 0  }
   0x2   :  { %s1150_s23 = smov 0   ;;  %s1152_s24 = smov 0  }
   0x3 LB: > { %s1167_s25 = sadd.s32 4294967295, %s1105_s24   ;;  %s874_s26 = sadd.s32 4294967294, %s1105_s24   ;;  %s1105_s24 = sphi %s1152_s24, %s1343_s24   ;;  %s1101_s23 = sphi %s1150_s23, %s1342_s23   ;;  %s1097_s22 = sphi %s1148_s22, %s1341_s22   ;;  %s1093_s21 = sphi %s1146_s21, %s1340_s21  }
   0x4   : > { %s1171_s27 = sadd.s32 1, %s1105_s24   ;;  %s137_s28 = sadd.s32 1, %s1101_s23 }
   0x5   : > { %s134_s29 = ssub.s32 %s1105_s24, %s1171_s27  ;;  %p147_p0 = scmp.ne.s32.totalorder %s1101_s23, %s1097_s22 }
   0x6   : > { %p135_p1 = scmp.eq.s32.totalorder %s134_s29, 0  ;;  %p148_p2 = scmp.eq.s32.totalorder %s1167_s25, 1 }
   0x7   : > { %p153_p3 = scmp.ne.s32.totalorder %s1097_s22, %s1093_s21  ;;  %p154_p4 = scmp.eq.s32.totalorder %s874_s26, 1 }
   0x8   : > { %s1182_s30 = scalar_select %p135_p1, %s1101_s23, %s137_s28  }
   0x9   : > { %p1184_p5 = por %p148_p2, %p147_p0  ;;  %p1188_p6 = por %p154_p4, %p153_p3 }
   0xa   : > { %p877_p7 = scmp.ge.s32.totalorder %s1105_s24, 1  ;;  %p217_p8 = scmp.lt.s32.totalorder %s1105_s24, 3 }
   0xc   : > { %p218_p9 = pnand %p877_p7, %p217_p8 }
   0xd   : > { %v259_v0 = vld [vmem:[%s1332_s1] sm:$0xff] (!%p218_p9)  ;;  %v260_v1 = vld [vmem:[%s1332_s1 + $0x8] sm:$0xff] (!%p218_p9)  ;;  %v261_v2 = vld [vmem:[%s1332_s1 + $0x10] sm:$0xff] (!%p218_p9)  ;;  %v1107_v3 = vmov (!%p218_p9), 0.0|0.0   ;;  %vm1108_vm0 = vmmov (!%p218_p9), 0   ;;  %v1109_v6 = vmov (!%p218_p9), 0.0  }
   0xe   : > { %221 = sbr.rel (%p218_p9) target bundleno = 1192 (0x4a8), region = 40  ;;  %951 = vmatprep.subr.bf16.mxu0 (!%p218_p9), %v1107_v3  ;;  %v952_v4 = vpack.c.bf16 (!%p218_p9), %v260_v1, %v259_v0  ;;  %v262_v5 = vld [vmem:[%s1332_s1 + $0x18] sm:$0xff] (!%p218_p9)  ;;  %918 = vmatprep.mubr.msk.f32.mxu0 (!%p218_p9), %vm1108_vm0, %v1109_v6  ;;  %p250_p10 = scmp.lt.s32.totalorder (!%p218_p9), %s1167_s25, 1  ;;  %vm265_vm1 = vcmask (!%p218_p9), 261120   ;;  %v585_v9 = vld [vmem:[%s1334_s3] sm:$0xff] (!%p218_p9)  ;;  %v586_v10 = vld [vmem:[%s1334_s3 + $0x8] sm:$0xff] (!%p218_p9) }
   0xf   : > { %957 = vmatprep.subr.bf16.mxu1 (!%p218_p9), %v1107_v3  ;;  %925 = vmatprep.mubr.msk.f32.mxu1 (!%p218_p9), %vm1108_vm0, %v1109_v6  ;;  %v955_v7 = vpack.c.bf16 (!%p218_p9), %v262_v5, %v261_v2  ;;  %v587_v11 = vld [vmem:[%s1334_s3 + $0x10] sm:$0xff] (!%p218_p9)  ;;  %v961_v12 = vpack.c.bf16 (!%p218_p9), %v586_v10, %v585_v9  ;;  %v588_v13 = vld [vmem:[%s1334_s3 + $0x18] sm:$0xff] (!%p218_p9)  ;;  %vm340_vm2 = vcmask (!%p218_p9), 130048   ;;  %v263_v19 = vld [vmem:[%s1333_s2] sm:$0xff] (!%p218_p9)  ;;  %s241_s10 = sand.u32 (!%p218_p9), 1, %s1097_s22   ;;  %s889_s12 = sshll.u32 (!%p218_p9), %s1167_s25, 7 }
  0x10   : > { %953 = vmatpush3.bf16.msra.mxu0 (!%p218_p9), %v952_v4  ;;  %v964_v14 = vpack.c.bf16 (!%p218_p9), %v588_v13, %v587_v11  ;;  %v264_v20 = vld [vmem:[%s1333_s2 + $0x8] sm:$0xff] (!%p218_p9)  ;;  %v589_v0 = vld [vmem:[%s1335_s4] sm:$0xff] (!%p218_p9)  ;;  %v530_v11 = vlaneseq (!%p218_p9)  ;;  %s878_s11 = sshll.u32 (!%p218_p9), %s241_s10, 3  ;;  %vm583_vm11 = vcmask (!%p218_p9), 64512   ;;  %s1282_s19 = scalar_lea.hbm (!%p218_p9), %s1336_s5, %s889_s12 }
  0x11   : > { %954 = vmatprep.subr.bf16.mxu0 (!%p218_p9), %v1107_v3  ;;  %v958_v21 = vpack.c.bf16 (!%p218_p9), %v264_v20, %v263_v19  ;;  %v590_v1 = vld [vmem:[%s1335_s4 + $0x8] sm:$0xff] (!%p218_p9)  ;;  %s243_s13 = scalar_lea.vmem (!%p218_p9), [#allocation2], %s878_s11  ;;  %s771_s20 = scalar_lea.sflag (!%p218_p9), [#allocation3], %s241_s10 }
  0x12   : > { %v533_v13 = vshrl.u32 (!%p218_p9), %v530_v11, 7  ;;  %s788_s14 = sshll.u32 (!%p218_p9), %s243_s13, 4  ;;  %s1284_s14 = int_to_ptr.vmem [resolvable:$true] %s788_s14 }
  0x13   : > { %959 = vmatpush3.bf16.msra.mxu1 (!%p218_p9), %v958_v21 }
  0x14   : > { %956 = vmatpush3.bf16.msra.mxu0 (!%p218_p9), %v955_v7  ;;  %928 = vmatprep.subr.mxu1 (!%p218_p9), %v1109_v6  ;;  %v967_v7 = vpack.c.bf16 (!%p218_p9), %v590_v1, %v589_v0 }
  0x15   : > { %s1214_s17 = scalar_select %p250_p10, %s1167_s25, 1  ;;  %960 = vmatprep.subr.bf16.mxu0 %v1107_v3 }
  0x16   : > { %s1110_s25 = smov [#allocation2]  }
  0x17   : > { %s879_s18 = sshll.u32 %s1214_s17, 3  ;;  %s1047_s28 = sshll.u32 %s1110_s25, 4  ;;  %s1048_s28 = int_to_ptr.vmem [resolvable:$false] %s1047_s28 }
  0x18   : > { %s253_s26 = scalar_lea.vmem %s1331_s0, %s879_s18  ;;  %s1049_s29 = scalar_lea.vmem %s1048_s28, 256 }
  0x19   : > { %v258_v8 = vld [vmem:[%s253_s26] sm:$0xff]  ;;  %s1043_s26 = scalar_lea.vmem %s1284_s14, 128  ;;  %p1050_p0 = scmp.lt.s32.totalorder %s1284_s14, %s1048_s28 }
  0x1a   : > { %919 = vmatmul.mubr.msk.f32.vlgmr.msra.gmra.mrb[0].mxu0 %vm265_vm1, %v258_v8  ;;  %p1044_p11 = scmp.ne.s32.totalorder %s1284_s14, %s1043_s26  ;;  %p1051_p1 = scmp.lt.s32.totalorder %s1049_s29, %s1043_s26 }
  0x1b   : > { %941 = vmatprep.mubr.msk.f32.mxu0 %vm1108_vm0, %v1109_v6  ;;  %962 = vmatpush3.bf16.msra.mxu0 %v961_v12  ;;  %v531_v12 = vand.u32 127, %v530_v11 }
  0x1c   : > { %963 = vmatprep.subr.bf16.mxu0 %v1107_v3  ;;  %p1045_p12 = pnand %p1044_p11, %p1184_p5  ;;  %p1052_p2 = por %p1051_p1, %p1050_p0 }
  0x1e   : > { %p1046_p13 = pneg %p1045_p12 }
  0x1f   : > { %965 = vmatpush3.bf16.msra.mxu0 %v964_v14  ;;  %v534_v14 = vsub.s32 %v531_v12, %v533_v13 }
  0x20   : > { %p1053_p3 = pnand %p1052_p2, %p1046_p13 }
  0x22   : > { %942 = vmatmul.mubr.msk.f32.vlgmr.msra.gmra.mrb[2].mxu0 %vm265_vm1, %v258_v8 }
  0xed   : > { %v335_v15 = vpop.f32.mrb[0].mxu0 }
  0xee   : > { %v920_v16 = vpop.f32.mrb[1].mxu0  ;;  %v339_v17 = vmul.f32 %v335_v15, %v335_v15 }
  0xf0   : > { %v341_v18 = vsel %vm340_vm2, %v339_v17, 0.0 }
  0xf1   : > { %342 = vadd.xlane.f32.xlu0 %v341_v18 }
  0xf5   : > { %v1247_v22 = vpop.f32.mrb[2].mxu0 }
  0xf6   : > { %v661_v23 = vmul.f32 %v1247_v22, %v1247_v22  ;;  %v943_v24 = vpop.f32.mrb[3].mxu0 }
  0xf8   : > { %v662_v25 = vsel %vm340_vm2, %v661_v23, 0.0 }
  0xf9   : > { %663 = vadd.xlane.f32.xlu1 %v662_v25 }
 0x17e   : > { %v343_v26 = vpop.xlane.xlu0 %342 }
 0x17f   : > { %1011 = vrsqrt.f32 %v343_v26  ;;  %v351_v28 = vmax.f32 %v343_v26, 1e-30  ;;  %vm346_vm3 = vcmp.eq.f32.partialorder %v343_v26, inf  ;;  %v349_v30 = vand.u32 2147483648, %v343_v26 }
 0x180   : > { %vm348_vm4 = vcmp.eq.f32.partialorder %v343_v26, 0.0 }
 0x181   : > { %1013 = vrsqrt.f32 %v351_v28 }
 0x186   : > { %v664_v41 = vpop.xlane.xlu1 %663 }
 0x187   : > { %vm667_vm6 = vcmp.eq.f32.partialorder %v664_v41, inf  ;;  %v670_v54 = vand.u32 2147483648, %v664_v41  ;;  %vm669_vm8 = vcmp.eq.f32.partialorder %v664_v41, 0.0  ;;  %v672_v57 = vmax.f32 %v664_v41, 1e-30 }
 0x189   : > { %v1012_v27 = vpop.eup %1011 }
 0x18a   : > { %v345_v29 = vmul.f32 %v1012_v27, %v343_v26 }
 0x18b   : > { %v1014_v33 = vpop.eup %1013 }
 0x18c   : > { %v347_v31 = vsel %vm346_vm3, %v343_v26, %v345_v29 }
 0x18d   : > { %v350_v32 = vsel %vm348_vm4, %v349_v30, %v347_v31 }
 0x18e   : > { %1015 = vtanh.f32 %v350_v32  ;;  %v445_v53 = vmin.f32 %v350_v32, 8.317766 }
 0x18f   : > { %1017 = vrsqrt.f32 %v664_v41 }
 0x198   : > { %v1016_v34 = vpop.eup %1015 }
 0x199   : > { %v354_v35 = vmul.f32 %v1016_v34, %v1014_v33  ;;  %v442_v43 = vmax.f32 %v1016_v34, 1e-15  ;;  %v1018_v44 = vpop.eup %1017 }
 0x19a   : > { %v666_v47 = vmul.f32 %v1018_v44, %v664_v41 }
 0x19b   : > { %v355_v36 = vmul.f32 %v354_v35, %v335_v15 }
 0x19c   : > { %v668_v56 = vsel %vm667_vm6, %v664_v41, %v666_v47 }
 0x19d   : > { %926 = vmatmul.mubr.msk.f32.vlgmr.msra.gmra.mrb[0].mxu1 %vm340_vm2, %v355_v36  ;;  %v1256_v59 = vsel %vm669_vm8, %v670_v54, %v668_v56 }
 0x19e   : > { %930 = vmatprep.mubr.msk.f32.mxu1 %vm1108_vm0, %v1109_v6 }
 0x270   : > { %v425_v37 = vpop.f32.mrb[0].mxu1 }
 0x271   : > { %v429_v38 = vmul.f32 %v425_v37, %v425_v37  ;;  %v927_v39 = vpop.f32.mrb[1].mxu1 }
 0x273   : > { %v430_v40 = vsel %vm340_vm2, %v429_v38, 0.0 }
 0x274   : > { %431 = vadd.xlane.f32.xlu0 %v430_v40 }
 0x301   : > { %v432_v42 = vpop.xlane.xlu0 %431 }
 0x302   : > { %1019 = vrsqrt.f32 %v432_v42  ;;  %vm435_vm5 = vcmp.eq.f32.partialorder %v432_v42, inf  ;;  %v438_v48 = vand.u32 2147483648, %v432_v42  ;;  %vm437_vm7 = vcmp.eq.f32.partialorder %v432_v42, 0.0 }
 0x303   : > { %1021 = vrcp.f32 %v442_v43  ;;  %v440_v52 = vmax.f32 %v432_v42, 1e-30 }
 0x305   : > { %1023 = vrsqrt.f32 %v440_v52 }
 0x30c   : > { %v1020_v45 = vpop.eup %1019 }
 0x30d   : > { %v434_v46 = vmul.f32 %v1020_v45, %v432_v42  ;;  %v1022_v50 = vpop.eup %1021 }
 0x30f   : > { %v436_v49 = vsel %vm435_vm5, %v432_v42, %v434_v46  ;;  %v1024_v60 = vpop.eup %1023 }
 0x310   : > { %v439_v51 = vsel %vm437_vm7, %v438_v48, %v436_v49 }
 0x311   : > { %v444_v55 = vmul.f32 %v1022_v50, %v439_v51 }
 0x313   : > { %v446_v58 = vmul.f32 %v445_v53, %v444_v55 }
 0x315   : > { %1025 = vtanh.f32 %v446_v58 }
 0x316   : > { %1027 = vrsqrt.f32 %v672_v57 }
 0x317   : > { %1029 = vtanh.f32 %v1256_v59 }
 0x31f   : > { %v1026_v61 = vpop.eup %1025 }
 0x320   : > { %v448_v62 = vmul.f32 %v1026_v61, %v1024_v60  ;;  %v1028_v63 = vpop.eup %1027 }
 0x321   : > { %v1265_v2 = vpop.eup %1029 }
 0x322   : > { %v449_v4 = vmul.f32 %v448_v62, %v425_v37  ;;  %v675_v8 = vmul.f32 %v1265_v2, %v1028_v63 }
 0x324   : > { %929 = vmatpush3.xpose.msk.msra.mxu1 %vm340_vm2, %v449_v4  ;;  %v523_v5 = vmul.f32 %v449_v4, %v449_v4  ;;  %v676_v10 = vmul.f32 %v675_v8, %v1247_v22 }
 0x325   : > { %966 = vmatprep.subr.bf16.mxu1 %v1107_v3 }
 0x326   : > { %v524_v9 = vsel %vm340_vm2, %v523_v5, 0.0 }
 0x327   : > { %931 = vmatmul.mubr.msk.f32.vlgmr.msra.gmra.mrb[2].mxu1 %vm340_vm2, %v449_v4  ;;  %525 = vadd.xlane.f32.xlu1 %v524_v9 }
 0x328   : > { %968 = vmatpush3.bf16.msra.mxu1 %v967_v7  ;;  %948 = vmatprep.mubr.msk.f32.mxu1 %vm1108_vm0, %v1109_v6 }
 0x32b   : > { %949 = vmatmul.mubr.msk.f32.vlgmr.msra.gmra.mrb[4].mxu1 %vm340_vm2, %v676_v10 }
 0x3b4   : > { %v526_v3 = vpop.xlane.xlu1 %525 }
 0x3b5   : > { %v535_v18 = vrot.slane %v526_v3, %v534_v14  ;;  %v550_v21 = vsub.f32 1.0, %v526_v3 }
 0x3b7   : > { %v557_v27 = vmul.f32 %v550_v21, %v550_v21  ;;  %v560_v32 = vmul.f32 %v535_v18, %v526_v3 }
 0x3b9   : > { %v558_v31 = vmul.f32 %v557_v27, %v535_v18 }
 0x3fa   : > { %v519_v15 = vpop.f32.mrb[2].mxu1 }
 0x3fb   : > { %v527_v16 = vmul.f32 2.0, %v519_v15  ;;  %v932_v17 = vpop.f32.mrb[3].mxu1 }
 0x3fd   : > { %v528_v19 = vsub.f32 1.0, %v527_v16 }
 0x3fe   : > { %v746_v20 = vpop.f32.mrb[4].mxu1 }
 0x3ff   : > { %v549_v23 = vadd.f32 %v535_v18, %v528_v19  ;;  %v750_v24 = vmul.f32 %v746_v20, %v746_v20  ;;  %v950_v25 = vpop.f32.mrb[5].mxu1  ;;  %v561_v35 = vadd.f32 %v560_v32, %v528_v19 }
 0x401   : > { %v551_v6 = vmul.f32 %v549_v23, %v549_v23  ;;  %v553_v26 = vmul.f32 2.0, %v549_v23  ;;  %v751_v22 = vsel %vm340_vm2, %v750_v24, 0.0  ;;  %v562_v37 = vmax.f32 %v561_v35, 1e-15 }
 0x402   : > { %752 = vadd.xlane.f32.xlu0 %v751_v22 }
 0x403   : > { %v554_v28 = vmul.f32 %v553_v26, %v550_v21  ;;  %v552_v29 = vmul.f32 %v551_v6, %v526_v3 }
 0x405   : > { %v555_v30 = vmul.f32 %v554_v28, %v519_v15 }
 0x407   : > { %v556_v33 = vsub.f32 %v552_v29, %v555_v30 }
 0x409   : > { %v559_v34 = vadd.f32 %v558_v31, %v556_v33 }
 0x40b   : > { %v564_v36 = vmax.f32 %v559_v34, 0.0 }
 0x40d   : > { %1031 = vrsqrt.f32 %v564_v36  ;;  %vm567_vm9 = vcmp.eq.f32.partialorder %v564_v36, inf  ;;  %v570_v40 = vand.u32 2147483648, %v564_v36  ;;  %vm569_vm10 = vcmp.eq.f32.partialorder %v564_v36, 0.0 }
 0x40e   : > { %1033 = vrcp.f32 %v562_v37 }
 0x417   : > { %v1032_v38 = vpop.eup %1031 }
 0x418   : > { %v566_v39 = vmul.f32 %v1032_v38, %v564_v36  ;;  %v1034_v42 = vpop.eup %1033 }
 0x41a   : > { %v568_v41 = vsel %vm567_vm9, %v564_v36, %v566_v39 }
 0x41b   : > { %v571_v43 = vsel %vm569_vm10, %v570_v40, %v568_v41 }
 0x41c   : > { %v572_v44 = vmul.f32 %v1034_v42, %v571_v43 }
 0x41e   : > { %v885_v45 = vclamps-f32 %v572_v44, 0.9999999 }
 0x420   : > { %v576_v46 = vsub.f32 1.0, %v885_v45  ;;  %v575_v47 = vadd.f32 1.0, %v885_v45 }
 0x422   : > { %1035 = vrcp.f32 %v576_v46 }
 0x42c   : > { %v1036_v48 = vpop.eup %1035 }
 0x42d   : > { %v578_v49 = vmul.f32 %v1036_v48, %v575_v47 }
 0x42f   : > { %1037 = vlog2.f32 %v578_v49 }
 0x439   : > { %v1038_v50 = vpop.eup %1037 }
 0x43a   : > { %v580_v51 = vmul.f32 0.6931472, %v1038_v50 }
 0x43c   : > { %v581_v52 = vmul.f32 0.5, %v580_v51 }
 0x43e   : > { %v582_v53 = vmul.f32 2.0, %v581_v52 }
 0x440   : > { %584 = vst.msk [vmem:[%s243_s13] sm:$0xff] %vm583_vm11, %v582_v53 }
 0x441   : > { %1056 = shalt.err (!%p1053_p3)
}
 0x442   : > { %s1057_s9 = scalar_lea.hbm %s1282_s19, 128  ;;  %s1061_s12 = scalar_lea.hbm %s1336_s5, 256 }
 0x443   : > { %p1058_p4 = scmp.ne.s32.totalorder %s1282_s19, %s1057_s9  ;;  %p1062_p9 = scmp.lt.u32.totalorder %s1282_s19, %s1336_s5 }
 0x444   : > { %p1063_p10 = scmp.lt.u32.totalorder %s1061_s12, %s1057_s9  ;;  %p1065_p12 = scmp.lt.u32.totalorder %s1057_s9, %s1282_s19 }
 0x445   : > { %p1059_p7 = pnand %p1058_p4, %p1184_p5 }
 0x446   : > { %p1064_p11 = por %p1063_p10, %p1062_p9 }
 0x447   : > { %p1060_p8 = pneg %p1059_p7 }
 0x448   : > { %p1066_p13 = por %p1065_p12, %p1064_p11 }
 0x44a   : > { %p1067_p0 = pnand %p1066_p13, %p1060_p8 }
 0x44c   : > { %1070 = shalt.err (!%p1067_p0)
}
 0x44d   : > { %969 = dma.vmem_to_hbm [thread:$0]  (%p1184_p5), %s1284_s14, 128, %s1282_s19, %s771_s20   ;;  %v761_v55 = vmax.f32 %v1265_v2, 1e-15  ;;  %v764_v63 = vmin.f32 %v1256_v59, 8.317766  ;;  %vm768_vm14 = vcmask 7168  }
 0x44e   : > { %s257_s16 = scalar_lea.vmem %s1337_s6, %s879_s18 }
 0x48f   : > { %v753_v54 = vpop.xlane.xlu0 %752 }
 0x490   : > { %1039 = vrsqrt.f32 %v753_v54  ;;  %vm756_vm12 = vcmp.eq.f32.partialorder %v753_v54, inf  ;;  %v759_v58 = vand.u32 2147483648, %v753_v54  ;;  %vm758_vm13 = vcmp.eq.f32.partialorder %v753_v54, 0.0 }
 0x491   : > { %1041 = vrcp.f32 %v761_v55 }
 0x49a   : > { %v1040_v56 = vpop.eup %1039 }
 0x49b   : > { %v755_v57 = vmul.f32 %v1040_v56, %v753_v54  ;;  %v1042_v61 = vpop.eup %1041 }
 0x49d   : > { %v757_v60 = vsel %vm756_vm12, %v753_v54, %v755_v57 }
 0x49e   : > { %v760_v62 = vsel %vm758_vm13, %v759_v58, %v757_v60 }
 0x49f   : > { %v763_v0 = vmul.f32 %v1042_v61, %v760_v62 }
 0x4a1   : > { %v765_v1 = vmul.f32 %v764_v63, %v763_v0 }
 0x4a3   : > { %v766_v4 = vmin.f32 %v765_v1, 8.317766 }
 0x4a5   : > { %v767_v2 = vmul.f32 2.0, %v766_v4 }
 0x4a7   : > { %769 = vst.msk [vmem:[%s257_s16] sm:$0xff] %vm768_vm14, %v767_v2 }
 0x4a8 PF: > { %p975_p5 = scmp.ge.s32.totalorder %s1105_s24, 2  ;;  %s803_s19 = sand.u32 1, %s1093_s21  }
 0x4a9   : > { %s804_s20 = scalar_lea.sflag [#allocation3], %s803_s19 }
 0x4aa   : > { %p972_p1 = pnand %p975_p5, %p1188_p6 }
 0x4ac   : > { %1088 = dma.done.wait (!%p972_p1), %s804_s20, 128  }
 0x4ad   : > { %1090 = vsyncadd (!%p972_p1), %s804_s20, 4294967168  ;;  %p17_p2 = scmp.ge.s32.totalorder %s1171_s27, 4   ;;  %s1340_s21 = smov %s1097_s22 }
 0x4ae   : > { %s1341_s22 = smov %s1101_s23  ;;  %s1342_s23 = smov %s1182_s30 }
 0x4af   : > { %s1343_s24 = smov %s1171_s27  ;;  %19 = sbr.rel (!%p17_p2) target bundleno = 3 (0x3), region = 87 }
 0x4b6   :  { %816 = vsyncpa [#allocation3], 1 }
 0x4b7   :  { %818 = vsyncpa [#allocation3 + $0x1], 1 }

</bundles_post_ra>
